<compile_context>
chip_gen: v7x
topology: tpu7x:2x2x1
jax: 0.10.0
libtpu: 0.0.40
codegen_flags: <defaults>
</compile_context>

<pallas_src>
import functools
import jax
import jax.numpy as jnp
import numpy as np
from jax import lax
from jax.experimental import pallas as pl
from jax.experimental.pallas import tpu as pltpu

LN_EPS = 1e-5  # PyTorch nn.LayerNorm default
_MIB = 1 << 20


# ---------------------------------------------------------------------------
# Small helpers: tiling, hardware queries, compiler params.
# ---------------------------------------------------------------------------
def _largest_divisor_at_most(n, target, quantum=1):
    """Largest divisor of n that is <= target, preferring multiples of `quantum`.
    Returning n itself (full dim) is always BlockSpec-legal."""
    target = max(1, min(n, int(target)))
    if n <= target:
        return n
    best = 1
    for t in range(target, 0, -1):
        if n % t == 0:
            if t % quantum == 0:
                return t
            if best == 1:
                best = t
    return best


def _tpu_info():
    try:
        return pltpu.get_tpu_info()
    except Exception:
        return None


def _vmem_capacity_bytes():
    info = _tpu_info()
    cap = getattr(info, "vmem_capacity_bytes", None) if info is not None else None
    return int(cap) if cap else (64 * _MIB)   # conservative (v7x) fallback


def _num_tensorcores():
    info = _tpu_info()
    if info is not None:
        for attr in ("num_cores", "core_count", "tensorcore_count"):
            v = getattr(info, attr, None)
            if v:
                try:
                    return int(v)
                except Exception:
                    pass
    return 1


def _vmem_budget():
    # Usable budget for pipelined blocks: half of physical VMEM (capped), headroom left
    # for Mosaic internal scratch / vregs.
    return int(min(_vmem_capacity_bytes(), 96 * _MIB) * 0.5)


def _mosaic_params(needed_bytes, dims):
    limit = int(min(max(int(needed_bytes) + 8 * _MIB, 16 * _MIB), 64 * _MIB))
    return pltpu.CompilerParams(dimension_semantics=dims, vmem_limit_bytes=limit)


def _const_block_spec(shape, index_map):
    # Grid-invariant block: single-buffer it (halves its VMEM footprint). Fall back to a
    # plain BlockSpec if this jax version's BlockSpec lacks the pipeline_mode field.
    try:
        return pl.BlockSpec(shape, index_map, pipeline_mode=pl.Buffered(1))
    except TypeError:
        return pl.BlockSpec(shape, index_map)


# ---------------------------------------------------------------------------
# Pallas kernel 1: hoisted input projection  pre_x = X @ W_x   (all timesteps)
#   bf16 operands, f32 MXU accumulation, bf16 output (halves pre_x HBM round trip).
#   Column tiles are the OUTER grid axis so each W_x column tile is DMA'd once.
# ---------------------------------------------------------------------------
def _in_proj_kernel(x_ref, wx_ref, o_ref):
    o_ref[...] = jnp.dot(x_ref[...], wx_ref[...],
                         preferred_element_type=jnp.float32).astype(o_ref.dtype)


def input_projection(x2d_bf16, wx_bf16):
    N, Din = x2d_bf16.shape
    G3 = wx_bf16.shape[1]
    budget = _vmem_budget()
    tn = _largest_divisor_at_most(G3, 2048, 128)
    per_row = 2 * (Din * 2 + tn * 2)          # x tile (bf16) + out tile (bf16), 2 bufs
    fixed = 2 * (Din * tn * 2)                # wx column tile (bf16), 2 bufs
    tm_max = max(8, (budget - fixed) // max(per_row, 1))
    tm = _largest_divisor_at_most(N, min(512, tm_max), 8)
    needed = fixed + tm * per_row
    return pl.pallas_call(
        _in_proj_kernel,
        out_shape=jax.ShapeDtypeStruct((N, G3), jnp.bfloat16),
        grid_spec=pltpu.PrefetchScalarGridSpec(
            num_scalar_prefetch=0,
            grid=(G3 // tn, N // tm),          # columns OUTER: wx streamed once
            in_specs=[pl.BlockSpec((tm, Din), lambda j, i: (i, 0)),
                      pl.BlockSpec((Din, tn), lambda j, i: (0, j))],
            out_specs=pl.BlockSpec((tm, tn), lambda j, i: (i, j)),
        ),
        compiler_params=_mosaic_params(needed, ("parallel", "parallel")),
    )(x2d_bf16, wx_bf16)


# ---------------------------------------------------------------------------
# Pallas kernel 2: LSTM recurrence (hidden-to-hidden part only), chunked over time.
#   pre = pre_x[t] + h_{t-1} @ W_h
#   f,o,g = split(pre); each layer-normed
#   f = sigmoid(f + 1); i = 1 - f; o = sigmoid(o); g = tanh(g)
#   c_t = f*c_{t-1} + i*g ; h_t = o*tanh(c_t)
# grid = (batch_blocks, time_chunks); h/c carried in VMEM scratch (f32).
# ---------------------------------------------------------------------------
def _lstm_rec_kernel(prex_ref, wh_ref, gamma_ref, beta_ref, h0_ref, c0_ref,
                     out_ref, hN_ref, cN_ref, h_sc, c_sc, *, nhid, t_chunk):
    s = pl.program_id(1)

    @pl.when(s == 0)
    def _():
        h_sc[...] = h0_ref[...]
        c_sc[...] = c0_ref[...]

    # Hoisted out of the per-timestep body: recurrent weight (bf16, loaded once per
    # grid step) and the LayerNorm scale/shift slices.
    wh = wh_ref[...]                           # (H, 3H) bf16
    g_f = gamma_ref[0:1, :]; b_f = beta_ref[0:1, :]
    g_o = gamma_ref[1:2, :]; b_o = beta_ref[1:2, :]
    g_g = gamma_ref[2:3, :]; b_g = beta_ref[2:3, :]

    def layernorm(v, g, b):
        # Two-pass form (matches nn.LayerNorm; avoids E[x^2]-mu^2 cancellation).
        mu = jnp.mean(v, axis=-1, keepdims=True)
        d = v - mu
        var = jnp.mean(d * d, axis=-1, keepdims=True)
        return d * lax.rsqrt(var + LN_EPS) * g + b

    def step(t, carry):
        h_prev, c_prev = carry
        # bf16 operands on the MXU with f32 accumulation; gate/cell math stays f32.
        pre = (prex_ref[t].astype(jnp.float32)
               + jnp.dot(h_prev.astype(jnp.bfloat16), wh,
                         preferred_element_type=jnp.float32))        # (tb, 3H)
        f = jax.nn.sigmoid(layernorm(pre[:, 0 * nhid:1 * nhid], g_f, b_f) + 1.0)
        i = 1.0 - f
        o = jax.nn.sigmoid(layernorm(pre[:, 1 * nhid:2 * nhid], g_o, b_o))
        g = jnp.tanh(layernorm(pre[:, 2 * nhid:3 * nhid], g_g, b_g))
        # TODO(synk): on v6e/v7x the four full-width transcendentals could run in packed
        # bf16 for ~2x EUP throughput; kept f32 for numerical fidelity.
        c_new = f * c_prev + i * g
        h_new = o * jnp.tanh(c_new)
        out_ref[t] = h_new
        return h_new, c_new

    h, c = lax.fori_loop(0, t_chunk, step, (h_sc[...], c_sc[...]), unroll=True)
    h_sc[...] = h
    c_sc[...] = c

    # Final state written only once, on the last time-chunk of this batch block.
    @pl.when(s == pl.num_programs(1) - 1)
    def _():
        hN_ref[...] = h
        cN_ref[...] = c


def lstm_layer(x, w_bf16, gamma, beta, h0, c0):
    S, B, Din = x.shape
    H = gamma.shape[-1]
    G3 = 3 * H
    wx = w_bf16[:Din, :]                      # (Din, 3H) bf16 -> hoisted matmul
    wh = w_bf16[Din:, :]                      # (H,   3H) bf16 -> resident in recurrence

    # Hoist the input-to-hidden matmul out of the serial time loop (bf16 activations).
    pre_x = input_projection(
        x.reshape(S * B, Din).astype(jnp.bfloat16), wx).reshape(S, B, G3)

    # Split the batch across TensorCores only when it actually helps:
    # >= 2 cores AND each half still feeds the MXU with >= 256 rows.
    tb = B
    if _num_tensorcores() >= 2 and B % 16 == 0 and (B // 2) >= 256:
        tb = B // 2

    # VMEM-budgeted time chunk: pre_x (bf16) and out (f32) blocks are double-buffered,
    # W_h is single-buffered (Buffered(1)).
    budget = _vmem_budget()
    fixed = (H * G3 * 2                        # W_h (bf16, single-buffered)
             + 2 * (3 * H * 4)                 # gamma + beta (single-buffered)
             + 2 * 4 * tb * H * 4              # h0/c0 in + hN/cN out (double-buffered)
             + 2 * tb * H * 4)                 # h/c scratch
    per_t = 2 * (tb * G3 * 2) + 2 * (tb * H * 4)
    t_max = max(1, (budget - fixed) // max(per_t, 1))
    t_chunk = _largest_divisor_at_most(S, min(8, t_max), 1)   # moderate unroll
    needed = fixed + t_chunk * per_t

    kernel = functools.partial(_lstm_rec_kernel, nhid=H, t_chunk=t_chunk)
    out, hN, cN = pl.pallas_call(
        kernel,
        out_shape=(jax.ShapeDtypeStruct((S, B, H), jnp.float32),
                   jax.ShapeDtypeStruct((B, H), jnp.float32),
                   jax.ShapeDtypeStruct((B, H), jnp.float32)),
        grid_spec=pltpu.PrefetchScalarGridSpec(
            num_scalar_prefetch=0,
            grid=(B // tb, S // t_chunk),
            in_specs=[
                pl.BlockSpec((t_chunk, tb, G3), lambda b, s: (s, b, 0)),   # pre_x (bf16)
                _const_block_spec((H, G3), lambda b, s: (0, 0)),           # W_h (bf16)
                _const_block_spec((3, H), lambda b, s: (0, 0)),            # LN gamma
                _const_block_spec((3, H), lambda b, s: (0, 0)),            # LN beta
                pl.BlockSpec((tb, H), lambda b, s: (b, 0)),                # h0
                pl.BlockSpec((tb, H), lambda b, s: (b, 0)),                # c0
            ],
            out_specs=(
                pl.BlockSpec((t_chunk, tb, H), lambda b, s: (s, b, 0)),    # output seq
                pl.BlockSpec((tb, H), lambda b, s: (b, 0)),                # final h
                pl.BlockSpec((tb, H), lambda b, s: (b, 0)),                # final c
            ),
            scratch_shapes=[pltpu.VMEM((tb, H), jnp.float32),
                            pltpu.VMEM((tb, H), jnp.float32)],
        ),
        compiler_params=_mosaic_params(needed, ("parallel", "arbitrary")),
    )(pre_x, wh, gamma, beta, h0, c0)
    return out, hN, cN


# ---------------------------------------------------------------------------
# Pallas kernel 3a: projection  h2 = x @ Wp + bp   (stored bf16 for the decoder)
# ---------------------------------------------------------------------------
def _proj_kernel(x_ref, pw_ref, pb_ref, o_ref):
    o_ref[...] = (jnp.dot(x_ref[...], pw_ref[...],
                          preferred_element_type=jnp.float32)
                  + pb_ref[...]).astype(o_ref.dtype)


def projection(x2d_bf16, proj_w_bf16, proj_b):
    N, nhid = x2d_bf16.shape
    ninp = proj_w_bf16.shape[1]
    budget = _vmem_budget()
    fixed = nhid * ninp * 2 + ninp * 4          # Wp + bp, single-buffered
    per_row = 2 * (nhid * 2 + ninp * 2)         # x tile (bf16) + out tile (bf16), 2 bufs
    tm_max = max(8, (budget - fixed) // max(per_row, 1))
    tm = _largest_divisor_at_most(N, min(512, tm_max), 8)
    needed = fixed + tm * per_row
    return pl.pallas_call(
        _proj_kernel,
        out_shape=jax.ShapeDtypeStruct((N, ninp), jnp.bfloat16),
        grid_spec=pltpu.PrefetchScalarGridSpec(
            num_scalar_prefetch=0,
            grid=(N // tm,),
            in_specs=[pl.BlockSpec((tm, nhid), lambda i: (i, 0)),
                      _const_block_spec((nhid, ninp), lambda i: (0, 0)),
                      _const_block_spec((1, ninp), lambda i: (0, 0))],
            out_specs=pl.BlockSpec((tm, ninp), lambda i: (i, 0)),
        ),
        compiler_params=_mosaic_params(needed, ("parallel",)),
    )(x2d_bf16, proj_w_bf16, proj_b.reshape(1, -1))


# ---------------------------------------------------------------------------
# Pallas kernel 3b: tied-weight decoder  y = h2 @ Wd + bd
#   Vocab tiles are the OUTER grid axis so each decoder-weight column tile is
#   streamed from HBM exactly once; the (much smaller) projected hidden is re-streamed.
# ---------------------------------------------------------------------------
def _decode_kernel(h_ref, dw_ref, db_ref, o_ref):
    o_ref[...] = jnp.dot(h_ref[...], dw_ref[...],
                         preferred_element_type=jnp.float32) + db_ref[...]


def decode(h2d_bf16, dec_w_bf16, dec_b):
    N, ninp = h2d_bf16.shape
    ntoken = dec_w_bf16.shape[1]
    budget = _vmem_budget()
    tn = _largest_divisor_at_most(ntoken, 1024, 128)
    per_row = 2 * (ninp * 2 + tn * 4)            # h tile (bf16) + out tile (f32), 2 bufs
    fixed = 2 * (ninp * tn * 2 + tn * 4)         # dec_w column tile + bias tile, 2 bufs
    tm_max = max(8, (budget - fixed) // max(per_row, 1))
    tm = _largest_divisor_at_most(N, min(1024, tm_max), 8)
    needed = fixed + tm * per_row
    return pl.pallas_call(
        _decode_kernel,
        out_shape=jax.ShapeDtypeStruct((N, ntoken), jnp.float32),
        grid_spec=pltpu.PrefetchScalarGridSpec(
            num_scalar_prefetch=0,
            grid=(ntoken // tn, N // tm),        # vocab OUTER: dec_w streamed once
            in_specs=[pl.BlockSpec((tm, ninp), lambda j, i: (i, 0)),
                      pl.BlockSpec((ninp, tn), lambda j, i: (0, j)),
                      pl.BlockSpec((1, tn), lambda j, i: (0, j))],
            out_specs=pl.BlockSpec((tm, tn), lambda j, i: (i, j)),
        ),
        compiler_params=_mosaic_params(needed, ("parallel", "parallel")),
    )(h2d_bf16, dec_w_bf16, dec_b.reshape(1, -1))


# ---------------------------------------------------------------------------
# Model wrapper (glue: embedding gather, per-layer loop, reshapes).
# ---------------------------------------------------------------------------
def language_model_forward(params, tokens):
    S, B = tokens.shape
    # TODO(synk): embedding gather could be fused into the input-projection kernel via
    # scalar-prefetched token ids + a pl.Element row-gather BlockSpec; kept in XLA here.
    emb = jnp.take(params["emb"], tokens, axis=0)          # (S, B, ninp) f32
    # TODO(synk): dropouti/dropoutr/dropouth/dropouto are 0 in this config (identity).
    x = emb
    hiddens = []
    for l in range(len(params["lstm_w"])):
        H = params["lstm_gamma"][l].shape[-1]
        h0 = jnp.zeros((B, H), jnp.float32)
        c0 = jnp.zeros((B, H), jnp.float32)
        x, hN, cN = lstm_layer(x, params["lstm_w_bf16"][l],
                               params["lstm_gamma"][l], params["lstm_beta"][l],
                               h0, c0)
        hiddens.append((hN, cN))
    flat = x.reshape(S * B, x.shape[-1]).astype(jnp.bfloat16)
    proj = projection(flat, params["proj_w_bf16"], params["proj_b"])
    dec = decode(proj, params["dec_w_bf16"], params["dec_b"])
    return dec.reshape(S, B, -1), hiddens


# ---------------------------------------------------------------------------
# Pure-JAX reference for correctness check: mirrors the PyTorch forward at the same
# bf16 matmul precision used by the kernels (f32 MXU accumulation, f32 LN/cell state).
# ---------------------------------------------------------------------------
def reference_forward(params, tokens):
    S, B = tokens.shape
    x = jnp.take(params["emb"], tokens, axis=0)

    def bdot(a, b):
        return jnp.dot(a.astype(jnp.bfloat16), b.astype(jnp.bfloat16),
                       preferred_element_type=jnp.float32)

    def ln(v, g, b):
        mu = v.mean(-1, keepdims=True)
        d = v - mu
        var = (d * d).mean(-1, keepdims=True)
        return d * lax.rsqrt(var + LN_EPS) * g + b

    hiddens = []
    for l in range(len(params["lstm_w"])):
        w = params["lstm_w"][l]
        gamma, beta = params["lstm_gamma"][l], params["lstm_beta"][l]
        H = gamma.shape[-1]
        Din = x.shape[-1]
        wx, wh = w[:Din], w[Din:]
        # hoisted input projection, stored in bf16 (mirrors the kernel path)
        pre_x = bdot(x.reshape(S * B, Din), wx).astype(jnp.bfloat16)
        pre_x = pre_x.reshape(S, B, 3 * H).astype(jnp.float32)
        h = jnp.zeros((B, H), jnp.float32)
        c = jnp.zeros((B, H), jnp.float32)
        outs = []
        for t in range(S):
            pre = pre_x[t] + bdot(h, wh)
            f = jax.nn.sigmoid(ln(pre[:, :H], gamma[0], beta[0]) + 1.0)
            i = 1.0 - f
            o = jax.nn.sigmoid(ln(pre[:, H:2 * H], gamma[1], beta[1]))
            g = jnp.tanh(ln(pre[:, 2 * H:], gamma[2], beta[2]))
            c = f * c + i * g
            h = o * jnp.tanh(c)
            outs.append(h)
        x = jnp.stack(outs, 0)
        hiddens.append((h, c))
    flat = x.reshape(S * B, -1)
    proj = (bdot(flat, params["proj_w"]) + params["proj_b"]).astype(jnp.bfloat16)
    dec = bdot(proj, params["dec_w"]) + params["dec_b"]
    return dec.reshape(S, B, -1), hiddens


# ---------------------------------------------------------------------------
# Deterministic parameter construction (mirrors module __init__ shapes).
# ---------------------------------------------------------------------------
def init_params(key, ntoken, ninp, nhid, nlayers):
    dims = [ninp] + [nhid] * nlayers
    ks = jax.random.split(key, 4 + 3 * nlayers)
    emb = jax.random.uniform(ks[0], (ntoken, ninp), jnp.float32, -0.1, 0.1)
    lstm_w, lstm_gamma, lstm_beta = [], [], []
    for l, (din, dh) in enumerate(zip(dims[:-1], dims[1:])):
        stdv = 1.0 / np.sqrt(dh)
        lstm_w.append(jax.random.uniform(ks[1 + 3 * l], (din + dh, 3 * dh),
                                         jnp.float32, -stdv, stdv))
        # LayerNorm params (gamma=1, beta=0 after reset; perturb slightly, deterministic)
        lstm_gamma.append(1.0 + 0.05 * jax.random.uniform(ks[2 + 3 * l], (3, dh),
                                                          jnp.float32, -1.0, 1.0))
        lstm_beta.append(0.05 * jax.random.uniform(ks[3 + 3 * l], (3, dh),
                                                   jnp.float32, -1.0, 1.0))
    stdv_p = 1.0 / np.sqrt(nhid)
    proj_w = jax.random.uniform(ks[-3], (nhid, ninp), jnp.float32, -stdv_p, stdv_p)
    proj_b = jax.random.uniform(ks[-2], (ninp,), jnp.float32, -stdv_p, stdv_p)
    dec_w = emb.T                        # tied weights: decoder.weight = encoder.weight
    dec_b = jnp.zeros((ntoken,), jnp.float32)   # decoder.bias.data.fill_(0)
    params = dict(emb=emb, lstm_w=lstm_w, lstm_gamma=lstm_gamma, lstm_beta=lstm_beta,
                  proj_w=proj_w, proj_b=proj_b, dec_w=dec_w, dec_b=dec_b)
    # One-time bf16 copies of the matmul weights (MXU-native on all generations).
    params["lstm_w_bf16"] = [w.astype(jnp.bfloat16) for w in lstm_w]
    params["proj_w_bf16"] = proj_w.astype(jnp.bfloat16)
    params["dec_w_bf16"] = dec_w.astype(jnp.bfloat16)
    return params


if __name__ == "__main__":
    NTOKEN, NINP, NHID, NLAYERS = 64, 32, 32, 2
    SEQ, BATCH = 8, 8

    key = jax.random.PRNGKey(0)
    pkey, tkey = jax.random.split(key)
    params = init_params(pkey, NTOKEN, NINP, NHID, NLAYERS)
    tokens = jax.random.randint(tkey, (SEQ, BATCH), 0, NTOKEN, dtype=jnp.int32)

    out, hiddens = language_model_forward(params, tokens)
    out = jax.block_until_ready(out)

    # Reference mirrors the kernels' bf16 matmul precision, so only tiling/accumulation
    # order and bf16-rounding boundary effects remain -> 1e-2 tolerance is ample.
    ref_out, ref_hiddens = reference_forward(params, tokens)
    np.testing.assert_allclose(np.asarray(out), np.asarray(ref_out),
                               rtol=1e-2, atol=1e-2)
    for (h, c), (rh, rc) in zip(hiddens, ref_hiddens):
        np.testing.assert_allclose(np.asarray(h), np.asarray(rh), rtol=1e-2, atol=1e-2)
        np.testing.assert_allclose(np.asarray(c), np.asarray(rc), rtol=1e-2, atol=1e-2)

    assert out.shape == (SEQ, BATCH, NTOKEN)
    print("KERNEL_OK")
</pallas_src>

<mosaic_0001>
module attributes {stable_mosaic.version = 11 : i64} {
  func.func @_in_proj_kernel(%arg0: i32, %arg1: i32, %arg2: memref<64x32xbf16, #tpu.memory_space<vmem>>, %arg3: memref<32x96xbf16, #tpu.memory_space<vmem>>, %arg4: memref<64x96xbf16, #tpu.memory_space<vmem>>) attributes {dimension_semantics = [#tpu.dimension_semantics<parallel>, #tpu.dimension_semantics<parallel>], iteration_bounds = array<i64: 1, 1>, scalar_prefetch = 0 : i64, scratch_operands = 0 : i64, tpu.core_type = #tpu.core_type<tc>, window_params = [{transform_indices = @transform_0, window_bounds = array<i64: 64, 32>}, {transform_indices = @transform_1, window_bounds = array<i64: 32, 96>}, {transform_indices = @transform_2, window_bounds = array<i64: 64, 96>}]} {
    %c0 = arith.constant 0 : index
    %c0_0 = arith.constant 0 : index
    %0 = vector.load %arg2[%c0, %c0_0] : memref<64x32xbf16, #tpu.memory_space<vmem>>, vector<64x32xbf16>
    %c0_1 = arith.constant 0 : index
    %c0_2 = arith.constant 0 : index
    %1 = vector.load %arg3[%c0_1, %c0_2] : memref<32x96xbf16, #tpu.memory_space<vmem>>, vector<32x96xbf16>
    %cst = arith.constant dense<0.000000e+00> : vector<64x96xf32>
    %2 = tpu.matmul %0, %1, %cst {dimension_numbers = #tpu.dot_dimension_numbers<[1], [0], [0], [1], [0, 0, 1, 1], [], []>} : vector<64x32xbf16>, vector<32x96xbf16>, vector<64x96xf32> -> vector<64x96xf32>
    %3 = arith.truncf %2 : vector<64x96xf32> to vector<64x96xbf16>
    %c0_3 = arith.constant 0 : index
    %c0_4 = arith.constant 0 : index
    %4 = vector.load %arg4[%c0_3, %c0_4] : memref<64x96xbf16, #tpu.memory_space<vmem>>, vector<64x96xbf16>
    tpu.vector_store %arg4[%c0_3, %c0_4], %3 {strides = array<i32>} : memref<64x96xbf16, #tpu.memory_space<vmem>>, vector<64x96xbf16>,
    return
  }
  func.func @transform_0(%arg0: i32, %arg1: i32) -> (i32, i32) {
    %c0_i32 = arith.constant 0 : i32
    %c0_i32_0 = arith.constant 0 : i32
    return %arg1, %c0_i32 : i32, i32
  }
  func.func @transform_1(%arg0: i32, %arg1: i32) -> (i32, i32) {
    %c0_i32 = arith.constant 0 : i32
    %c0_i32_0 = arith.constant 0 : i32
    return %c0_i32, %arg0 : i32, i32
  }
  func.func @transform_2(%arg0: i32, %arg1: i32) -> (i32, i32) {
    %c0_i32 = arith.constant 0 : i32
    return %arg1, %arg0 : i32, i32
  }
}

</mosaic_0001>

<bundles_post_ra>
// kernel: tpu_custom_call.1
= control target key start
LH: loop header
LB: loop body
LE: loop exit
PB: predicated region body
PF: predicated region fallthrough
CT: control target
= control target key end

     0   :  { %vm57_vm0 = vcmask 261120   ;;  %s329_s0 = inlined_call_operand.vmem [shape: bf16[64,32], index: 0, kind: input, shape index: {}]   ;;  %s330_s1 = inlined_call_operand.vmem [shape: bf16[32,96], index: 1, kind: input, shape index: {}]   ;;  %s331_s2 = inlined_call_operand.hbm [shape: bf16[64,96], index: 2, kind: output, shape index: {}]  }
   0x1   :  { %v243_v0 = vld [vmem:[%s330_s1] sm:$0xff]   ;;  %v244_v1 = vld [vmem:[%s330_s1 + $0x8] sm:$0xff]   ;;  %v246_v3 = vld [vmem:[%s329_s0 + $0x10] sm:$0xff]  }
   0x2   :  { %224 = vmatprep.subr.bf16.mxu0 %v243_v0  ;;  %236 = vmatprep.subr.bf16.mxu1 %v243_v0  ;;  %v245_v2 = vld [vmem:[%s329_s0] sm:$0xff]   ;;  %v247_v4 = vld [vmem:[%s329_s0 + $0x8] sm:$0xff]   ;;  %v248_v5 = vld [vmem:[%s329_s0 + $0x18] sm:$0xff]  }
   0x3   :  { %225 = vmatpush3.bf16.msra.mxu0 %v243_v0  ;;  %238 = vmatpush3.bf16.msra.mxu1 %v243_v0 }
   0x4   :  { %226 = vmatprep.subr.bf16.mxu0 %v244_v1  ;;  %237 = vmatprep.subr.bf16.mxu1 %v244_v1 }
   0x5   :  { %228 = vmatprep.mubr.msk.bf16.mxu0 %vm57_vm0, %v245_v2  ;;  %232 = vmatprep.mubr.msk.bf16.mxu1 %vm57_vm0, %v246_v3 }
   0x6   :  { %7 = vsyncpa [#allocation3], 0  ;;  %vm167_vm1 = vcmask 781312   ;;  %s273_s20 = smov [#allocation2]  }
   0x7   :  { %227 = vmatpush3.bf16.msra.mxu0 %v244_v1  ;;  %239 = vmatpush3.bf16.msra.mxu1 %v244_v1  ;;  %s181_s21 = sshll.u32 %s273_s20, 4  ;;  %s182_s21 = int_to_ptr.vmem [resolvable:$true] %s181_s21 }
   0x8   :  { %s249_s0 = scalar_lea.vmem %s182_s21, 512  ;;  %p254_p1 = scmp.lt.s32.totalorder %s182_s21, %s182_s21 }
   0x9   :  { %p250_p0 = scmp.ne.s32.totalorder %s182_s21, %s249_s0  ;;  %p255_p2 = scmp.lt.s32.totalorder %s249_s0, %s249_s0 }
   0xa   :  { %229 = vmatmul.mubr.msk.bf16.vlgmr.msra.gmra.mrb[0].mxu0 %vm57_vm0, %v247_v4  ;;  %233 = vmatmul.mubr.msk.bf16.vlgmr.msra.gmra.mrb[0].mxu1 %vm57_vm0, %v248_v5 }
   0xb   :  { %p256_p3 = por %p255_p2, %p254_p1 }
   0xd   :  { %p257_p4 = pnand %p256_p3, %p250_p0 }
  0xdd   :  { %v230_v6 = vpop.f32.mrb[0].mxu0  ;;  %v234_v7 = vpop.f32.mrb[0].mxu1 }
  0xde   :  { %v212_v8 = vpack.c.bf16 %v230_v6, %v230_v6  ;;  %v216_v9 = vpack.c.bf16 %v234_v7, %v234_v7  ;;  %v104_v10 = vpop.f32.mrb[1].mxu0  ;;  %v120_v11 = vpop.f32.mrb[1].mxu1 }
  0xdf   :  { %v210_v12 = vpack.c.bf16 %v104_v10, %v104_v10  ;;  %v214_v13 = vpack.c.bf16 %v120_v11, %v120_v11  ;;  %v231_v14 = vpop.f32.mrb[2].mxu0  ;;  %v235_v15 = vpop.f32.mrb[2].mxu1 }
  0xe0   :  { %170 = vst.msk [vmem:[#allocation2 + $0x8] sm:$0xf] %vm167_vm1, %v212_v8  ;;  %174 = vst.msk [vmem:[#allocation2 + $0x18] sm:$0xf] %vm167_vm1, %v216_v9  ;;  %v213_v16 = vpack.c.bf16 %v231_v14, %v231_v14  ;;  %v217_v17 = vpack.c.bf16 %v235_v15, %v235_v15  ;;  %v107_v18 = vpop.f32.mrb[3].mxu0  ;;  %v123_v19 = vpop.f32.mrb[3].mxu1 }
  0xe1   :  { %168 = vst.msk [vmem:[#allocation2] sm:$0xf] %vm167_vm1, %v210_v12  ;;  %172 = vst.msk [vmem:[#allocation2 + $0x10] sm:$0xf] %vm167_vm1, %v214_v13  ;;  %v211_v20 = vpack.c.bf16 %v107_v18, %v107_v18  ;;  %v215_v21 = vpack.c.bf16 %v123_v19, %v123_v19 }
  0xe2   :  { %171 = vst.msk [vmem:[#allocation2 + $0xc] sm:$0xf] %vm167_vm1, %v213_v16  ;;  %175 = vst.msk [vmem:[#allocation2 + $0x1c] sm:$0xf] %vm167_vm1, %v217_v17 }
  0xe3   :  { %169 = vst.msk [vmem:[#allocation2 + $0x4] sm:$0xf] %vm167_vm1, %v211_v20  ;;  %173 = vst.msk [vmem:[#allocation2 + $0x14] sm:$0xf] %vm167_vm1, %v215_v21 }
  0xe4   :  { %260 = shalt.err (!%p257_p4)
}
  0xe5   :  { %s261_s24 = scalar_lea.hbm %s331_s2, 512 }
  0xe6   :  { %p262_p5 = scmp.ne.s32.totalorder %s331_s2, %s261_s24  ;;  %p265_p6 = scmp.lt.u32.totalorder %s261_s24, %s331_s2 }
  0xe8   :  { %p267_p7 = pnand %p265_p6, %p262_p5 }
  0xea   :  { %270 = shalt.err (!%p267_p7)
}
  0xeb   :  { %s274_s29 = smov 64   ;;  %s275_s30 = smov 4  }
  0xec   :  { %187 = dma.vmem_to_hbm [thread:$0]  %s182_s21, 512, %s331_s2, [#allocation3], %s274_s29, %s274_s29, %s275_s30  }
  0xed   :  { %271 = dma.done.wait [#allocation3], 512  }
  0xee   :  { %272 = vsyncadd [#allocation3], 4294966784 }
  0xef   :  { %191 = vsyncpa [#allocation3], 1 }

</bundles_post_ra>
